<compile_context>
chip_gen: v5e
topology: v5e:2x2
jax: 0.10.0
libtpu: 0.0.40
codegen_flags: <defaults>
</compile_context>

<pallas_src>
import jax
import jax.numpy as jnp
from jax.experimental import pallas as pl
from jax.experimental.pallas import tpu as pltpu


IN_DIMS = 25
FC1_DIMS = 256
FC2_DIMS = 256
OUT_DIMS = 1

# Contract the last dim of both operands (A @ B^T) -- same dimension numbers the
# TPU flash-attention kernel uses for q @ k^T, so Mosaic lowers it to the MXU.
_NT_DIM_NUMBERS = (((1,), (1,)), ((), ()))


def _round_up(x, m):
    return ((x + m - 1) // m) * m


def _critic_kernel(x_ref, w1_ref, b1_ref, w2_ref, b2_ref, w3_ref, b3_ref, o_ref):
    # Layer 1: (tb, 25) @ (25, 256) on the MXU (bf16 operands by default),
    # f32 accumulation; bias add + ReLU stay f32 on the VPU.
    x = x_ref[...].astype(w1_ref.dtype)
    h1 = jnp.dot(x, w1_ref[...], preferred_element_type=jnp.float32)
    h1 = jnp.maximum(h1 + b1_ref[...], 0.0)

    # Layer 2: (tb, 256) @ (256, 256) -- the dominant FLOP block.
    h2 = jnp.dot(h1.astype(w2_ref.dtype), w2_ref[...],
                 preferred_element_type=jnp.float32)
    h2 = jnp.maximum(h2 + b2_ref[...], 0.0)

    # Layer 3: 256 -> 1 as an MXU matmul w3 @ h2^T so the per-tile result is a
    # lane-dense (1, tb) row (no lane-sparse masked stores, and no cross-lane
    # XLU reduce stealing vector-extended issue slots from layer-2's MXU
    # pushes).  w3 is broadcast to 8 sublanes to keep the LHS a clean tile;
    # all 8 result rows are identical and row 0 is stored.
    w3_8 = jnp.broadcast_to(w3_ref[...], (8, FC2_DIMS))
    v8 = jax.lax.dot_general(w3_8, h2.astype(w3_ref.dtype), _NT_DIM_NUMBERS,
                             preferred_element_type=jnp.float32)   # (8, tb) f32
    o_ref[...] = (v8[0:1, :] + b3_ref[0, 0])[None]                 # (1, 1, tb)


def critic_forward(state, params, *, block_b=2048):
    """Critic MLP forward pass inside a single batch-tiled Pallas kernel.

    state:  (B, 25) float32
    params: w1 (25,256), b1 (1,256), w2 (256,256), b2 (1,256),
            w3 (1,256) [row layout == PyTorch (out,in)], b3 (1,1)
    returns (B, 1) float32
    """
    B = state.shape[0]
    block_b = max(8, _round_up(block_b, 8))

    # Batch tile: multiple of 8 sublanes, capped at block_b.  No host-side pad:
    # grid = cdiv(B, tb); the ragged last block's garbage tail rows never touch
    # valid rows (all math is row-independent) and are sliced off at the end.
    tb = min(block_b, _round_up(B, 8))
    # Keep >=2 grid steps for batches big enough to split so the "parallel"
    # batch axis can be sharded across v7x's two TensorCores.
    if B >= 512 and pl.cdiv(B, tb) < 2:
        tb = _round_up(pl.cdiv(B, 2), 8)
    grid_b = pl.cdiv(B, tb)

    def resident(rows, cols):
        # Weights / biases: same block every grid step -> stay VMEM-resident.
        return pl.BlockSpec((rows, cols), lambda i: (0, 0))

    out = pl.pallas_call(
        _critic_kernel,
        out_shape=jax.ShapeDtypeStruct((grid_b, 1, tb), jnp.float32),
        grid=(grid_b,),
        in_specs=[
            pl.BlockSpec((tb, IN_DIMS), lambda i: (i, 0)),         # state tile
            resident(IN_DIMS, FC1_DIMS),                           # w1
            resident(1, FC1_DIMS),                                 # b1
            resident(FC1_DIMS, FC2_DIMS),                          # w2
            resident(1, FC2_DIMS),                                 # b2
            resident(1, FC2_DIMS),                                 # w3 (row)
            pl.BlockSpec(memory_space=pltpu.MemorySpace.SMEM),     # b3 scalar
        ],
        out_specs=pl.BlockSpec((1, 1, tb), lambda i: (i, 0, 0)),   # lane-dense
        compiler_params=pltpu.CompilerParams(
            dimension_semantics=("parallel",),       # megacore sharding on v7x
            vmem_limit_bytes=32 * 1024 * 1024,       # clear v5e's 16 MiB default
        ),
    )(
        state,
        params["w1"], params["b1"],
        params["w2"], params["b2"],
        params["w3"], params["b3"],
    )
    # (grid_b, 1, tb) lane-dense rows -> (B, 1) column.
    return out.reshape(grid_b * tb, 1)[:B]


def init_params(key, weights_dtype=jnp.bfloat16):
    """PyTorch-style Linear init: U(-1/sqrt(fan_in), 1/sqrt(fan_in)).

    Layer-1/2 weights are stored transposed as (in, out) so the kernel does
    x @ w directly; w3 is a (1, 256) row (== PyTorch (out, in) layout).  Weights
    default to bf16 (native MXU dtype on v5e/v6e/v7x); biases stay float32.
    """
    def linear(k, fan_in, w_shape, b_shape):
        kw, kb = jax.random.split(k)
        bound = 1.0 / jnp.sqrt(float(fan_in))
        w = jax.random.uniform(kw, w_shape, jnp.float32, -bound, bound)
        b = jax.random.uniform(kb, b_shape, jnp.float32, -bound, bound)
        return w.astype(weights_dtype), b

    k1, k2, k3 = jax.random.split(key, 3)
    w1, b1 = linear(k1, IN_DIMS, (IN_DIMS, FC1_DIMS), (1, FC1_DIMS))
    w2, b2 = linear(k2, FC1_DIMS, (FC1_DIMS, FC2_DIMS), (1, FC2_DIMS))
    w3, b3 = linear(k3, FC2_DIMS, (1, FC2_DIMS), (1, 1))
    return {"w1": w1, "b1": b1, "w2": w2, "b2": b2, "w3": w3, "b3": b3}


def critic_reference(state, params):
    """Pure-JAX reference following the same dtype path as the kernel."""
    h1 = jnp.dot(state.astype(params["w1"].dtype), params["w1"],
                 preferred_element_type=jnp.float32)
    h1 = jnp.maximum(h1 + params["b1"], 0.0)
    h2 = jnp.dot(h1.astype(params["w2"].dtype), params["w2"],
                 preferred_element_type=jnp.float32)
    h2 = jnp.maximum(h2 + params["b2"], 0.0)
    v = jnp.dot(h2.astype(params["w3"].dtype), params["w3"].T,
                preferred_element_type=jnp.float32)
    return v + params["b3"]


if __name__ == "__main__":
    key = jax.random.PRNGKey(0)
    k_params, k_small, k_ragged = jax.random.split(key, 3)

    params = init_params(k_params)  # bf16 weights -> bf16 MXU path (default)

    # Small batch (typical PPO rollout step): single grid step, tb == 8.
    state_small = jax.random.normal(k_small, (8, IN_DIMS), jnp.float32)
    v_small = jax.block_until_ready(critic_forward(state_small, params))
    ref_small = critic_reference(state_small, params)
    assert v_small.shape == (8, OUT_DIMS), v_small.shape
    assert jnp.allclose(v_small, ref_small, atol=2e-3, rtol=2e-3), (
        "Pallas output does not match reference (small batch)"
    )

    # Ragged batch exercises the grid, the un-padded boundary block, the
    # lane-dense output reshaping, and resident-weight pipelining
    # (block_b=128 -> 2 grid steps, last one ragged: 200 = 128 + 72 rows).
    state_ragged = jax.random.normal(k_ragged, (200, IN_DIMS), jnp.float32)
    v_ragged = jax.block_until_ready(
        critic_forward(state_ragged, params, block_b=128)
    )
    ref_ragged = critic_reference(state_ragged, params)
    assert v_ragged.shape == (200, OUT_DIMS), v_ragged.shape
    assert jnp.allclose(v_ragged, ref_ragged, atol=2e-3, rtol=2e-3), (
        "Pallas output does not match reference (ragged batch)"
    )

    # TODO(synk): the Adam optimizer / device placement / training step in
    # CriticNetwork are host-side and not part of the forward kernel.
    print("KERNEL_OK")
</pallas_src>

<mosaic_0001>
module attributes {stable_mosaic.version = 11 : i64} {
  func.func @_critic_kernel(%arg0: i32, %arg1: memref<8x25xf32, #tpu.memory_space<vmem>>, %arg2: memref<25x256xbf16, #tpu.memory_space<vmem>>, %arg3: memref<1x256xf32, #tpu.memory_space<vmem>>, %arg4: memref<256x256xbf16, #tpu.memory_space<vmem>>, %arg5: memref<1x256xf32, #tpu.memory_space<vmem>>, %arg6: memref<1x256xbf16, #tpu.memory_space<vmem>>, %arg7: memref<1x1xf32, #tpu.memory_space<smem>>, %arg8: memref<1x1x8xf32, #tpu.memory_space<vmem>>) attributes {dimension_semantics = [#tpu.dimension_semantics<parallel>], iteration_bounds = array<i64: 1>, scalar_prefetch = 0 : i64, scratch_operands = 0 : i64, tpu.core_type = #tpu.core_type<tc>, window_params = [{transform_indices = @transform_0, window_bounds = array<i64: 8, 25>}, {pipeline_mode = #tpu.pipeline_mode<synchronous>, transform_indices = @transform_1, window_bounds = array<i64: 25, 256>}, {pipeline_mode = #tpu.pipeline_mode<synchronous>, transform_indices = @transform_2, window_bounds = array<i64: 1, 256>}, {pipeline_mode = #tpu.pipeline_mode<synchronous>, transform_indices = @transform_3, window_bounds = array<i64: 256, 256>}, {pipeline_mode = #tpu.pipeline_mode<synchronous>, transform_indices = @transform_4, window_bounds = array<i64: 1, 256>}, {pipeline_mode = #tpu.pipeline_mode<synchronous>, transform_indices = @transform_5, window_bounds = array<i64: 1, 256>}, {transform_indices = @transform_6, window_bounds = array<i64: 1, 1>}, {transform_indices = @transform_7, window_bounds = array<i64: 1, 1, 8>}]} {
    %c0 = arith.constant 0 : index
    %c0_0 = arith.constant 0 : index
    %0 = vector.load %arg1[%c0, %c0_0] : memref<8x25xf32, #tpu.memory_space<vmem>>, vector<8x25xf32>
    %1 = arith.truncf %0 : vector<8x25xf32> to vector<8x25xbf16>
    %c0_1 = arith.constant 0 : index
    %c0_2 = arith.constant 0 : index
    %2 = vector.load %arg2[%c0_1, %c0_2] : memref<25x256xbf16, #tpu.memory_space<vmem>>, vector<25x256xbf16>
    %cst = arith.constant dense<0.000000e+00> : vector<8x256xf32>
    %3 = tpu.matmul %1, %2, %cst {dimension_numbers = #tpu.dot_dimension_numbers<[1], [0], [0], [1], [0, 0, 1, 1], [], []>} : vector<8x25xbf16>, vector<25x256xbf16>, vector<8x256xf32> -> vector<8x256xf32>
    %c0_3 = arith.constant 0 : index
    %c0_4 = arith.constant 0 : index
    %4 = vector.load %arg3[%c0_3, %c0_4] : memref<1x256xf32, #tpu.memory_space<vmem>>, vector<1x256xf32>
    %5 = vector.broadcast %4 : vector<1x256xf32> to vector<8x256xf32>
    %6 = arith.addf %3, %5 : vector<8x256xf32>
    %cst_5 = arith.constant 0.000000e+00 : f32
    %7 = vector.broadcast %cst_5 : f32 to vector<8x256xf32>
    %8 = arith.maximumf %6, %7 : vector<8x256xf32>
    %9 = arith.truncf %8 : vector<8x256xf32> to vector<8x256xbf16>
    %c0_6 = arith.constant 0 : index
    %c0_7 = arith.constant 0 : index
    %10 = vector.load %arg4[%c0_6, %c0_7] : memref<256x256xbf16, #tpu.memory_space<vmem>>, vector<256x256xbf16>
    %cst_8 = arith.constant dense<0.000000e+00> : vector<8x256xf32>
    %11 = tpu.matmul %9, %10, %cst_8 {dimension_numbers = #tpu.dot_dimension_numbers<[1], [0], [0], [1], [0, 0, 1, 1], [], []>} : vector<8x256xbf16>, vector<256x256xbf16>, vector<8x256xf32> -> vector<8x256xf32>
    %c0_9 = arith.constant 0 : index
    %c0_10 = arith.constant 0 : index
    %12 = vector.load %arg5[%c0_9, %c0_10] : memref<1x256xf32, #tpu.memory_space<vmem>>, vector<1x256xf32>
    %13 = vector.broadcast %12 : vector<1x256xf32> to vector<8x256xf32>
    %14 = arith.addf %11, %13 : vector<8x256xf32>
    %cst_11 = arith.constant 0.000000e+00 : f32
    %15 = vector.broadcast %cst_11 : f32 to vector<8x256xf32>
    %16 = arith.maximumf %14, %15 : vector<8x256xf32>
    %c0_12 = arith.constant 0 : index
    %c0_13 = arith.constant 0 : index
    %17 = vector.load %arg6[%c0_12, %c0_13] : memref<1x256xbf16, #tpu.memory_space<vmem>>, vector<1x256xbf16>
    %18 = vector.shape_cast %17 : vector<1x256xbf16> to vector<1x256xbf16>
    %19 = vector.broadcast %18 : vector<1x256xbf16> to vector<8x256xbf16>
    %20 = arith.truncf %16 : vector<8x256xf32> to vector<8x256xbf16>
    %cst_14 = arith.constant dense<0.000000e+00> : vector<8x8xf32>
    %21 = tpu.matmul %19, %20, %cst_14 {dimension_numbers = #tpu.dot_dimension_numbers<[1], [1], [0], [0], [0, 0, 1, 0], [], []>} : vector<8x256xbf16>, vector<8x256xbf16>, vector<8x8xf32> -> vector<8x8xf32>
    %22 = vector.extract_strided_slice %21 {offsets = [0, 0], sizes = [1, 8], strides = [1, 1]} : vector<8x8xf32> to vector<1x8xf32>
    %c0_15 = arith.constant 0 : index
    %c0_16 = arith.constant 0 : index
    %23 = memref.load %arg7[%c0_15, %c0_16] : memref<1x1xf32, #tpu.memory_space<smem>>
    %24 = vector.broadcast %23 : f32 to vector<1x8xf32>
    %25 = arith.addf %22, %24 : vector<1x8xf32>
    %26 = vector.shape_cast %25 : vector<1x8xf32> to vector<1x1x8xf32>
    %c0_17 = arith.constant 0 : index
    %c0_18 = arith.constant 0 : index
    %c0_19 = arith.constant 0 : index
    %27 = vector.load %arg8[%c0_17, %c0_18, %c0_19] : memref<1x1x8xf32, #tpu.memory_space<vmem>>, vector<1x1x8xf32>
    tpu.vector_store %arg8[%c0_17, %c0_18, %c0_19], %26 {strides = array<i32>} : memref<1x1x8xf32, #tpu.memory_space<vmem>>, vector<1x1x8xf32>,
    return
  }
  func.func @transform_0(%arg0: i32) -> (i32, i32) {
    %c0_i32 = arith.constant 0 : i32
    %c0_i32_0 = arith.constant 0 : i32
    return %arg0, %c0_i32 : i32, i32
  }
  func.func @transform_1(%arg0: i32) -> (i32, i32) {
    %c0_i32 = arith.constant 0 : i32
    %c0_i32_0 = arith.constant 0 : i32
    %c0_i32_1 = arith.constant 0 : i32
    return %c0_i32, %c0_i32_0 : i32, i32
  }
  func.func @transform_2(%arg0: i32) -> (i32, i32) {
    %c0_i32 = arith.constant 0 : i32
    %c0_i32_0 = arith.constant 0 : i32
    %c0_i32_1 = arith.constant 0 : i32
    return %c0_i32, %c0_i32_0 : i32, i32
  }
  func.func @transform_3(%arg0: i32) -> (i32, i32) {
    %c0_i32 = arith.constant 0 : i32
    %c0_i32_0 = arith.constant 0 : i32
    %c0_i32_1 = arith.constant 0 : i32
    return %c0_i32, %c0_i32_0 : i32, i32
  }
  func.func @transform_4(%arg0: i32) -> (i32, i32) {
    %c0_i32 = arith.constant 0 : i32
    %c0_i32_0 = arith.constant 0 : i32
    %c0_i32_1 = arith.constant 0 : i32
    return %c0_i32, %c0_i32_0 : i32, i32
  }
  func.func @transform_5(%arg0: i32) -> (i32, i32) {
    %c0_i32 = arith.constant 0 : i32
    %c0_i32_0 = arith.constant 0 : i32
    %c0_i32_1 = arith.constant 0 : i32
    return %c0_i32, %c0_i32_0 : i32, i32
  }
  func.func @transform_6(%arg0: i32) -> (i32, i32) {
    %c0_i32 = arith.constant 0 : i32
    %c0_i32_0 = arith.constant 0 : i32
    %c0_i32_1 = arith.constant 0 : i32
    return %c0_i32, %c0_i32_0 : i32, i32
  }
  func.func @transform_7(%arg0: i32) -> (i32, i32, i32) {
    %c0_i32 = arith.constant 0 : i32
    %c0_i32_0 = arith.constant 0 : i32
    %c0_i32_1 = arith.constant 0 : i32
    return %arg0, %c0_i32, %c0_i32_0 : i32, i32, i32
  }
}

</mosaic_0001>

<bundles_post_ra>
// kernel: tpu_custom_call.1
= control target key start
LH: loop header
LB: loop body
LE: loop exit
PB: predicated region body
PF: predicated region fallthrough
CT: control target
= control target key end

     0   :  { %13 = vsyncpa [#allocation4], 0  ;;  %s826_s0 = inlined_call_operand.hbm [shape: f32[8,25], index: 0, kind: input, shape index: {}]   ;;  %s827_s1 = inlined_call_operand.hbm [shape: bf16[25,256], index: 1, kind: input, shape index: {}]   ;;  %s828_s2 = inlined_call_operand.vmem [shape: f32[1,256], index: 2, kind: input, shape index: {}]   ;;  %s829_s3 = inlined_call_operand.hbm [shape: bf16[256,256], index: 3, kind: input, shape index: {}]   ;;  %s830_s4 = inlined_call_operand.vmem [shape: f32[1,256], index: 4, kind: input, shape index: {}]   ;;  %s831_s5 = inlined_call_operand.vmem [shape: bf16[1,256], index: 5, kind: input, shape index: {}]   ;;  %s832_s6 = inlined_call_operand.<no memory space> [shape: f32[1,1], index: 6, kind: input, shape index: {}]   ;;  %s833_s7 = inlined_call_operand.hbm [shape: f32[1,1,8], index: 7, kind: output, shape index: {}]  }
   0x1   :  { %14 = vsyncpa [#allocation7], 0  ;;  %s31_s26 = sshll.u32 %s827_s1, 4  ;;  %s32_s26 = int_to_ptr.hbm [resolvable:$true] %s31_s26 }
   0x2   :  { %15 = vsyncpa [#allocation5], 0  ;;  %s753_s27 = smov [#allocation6]   ;;  %s21_s8 = sshll.u32 %s826_s0, 4  ;;  %s22_s8 = int_to_ptr.hbm [resolvable:$true] %s21_s8 }
   0x3   :  { %s33_s28 = sshll.u32 %s753_s27, 4  ;;  %s754_s9 = smov 128   ;;  %s34_s28 = int_to_ptr.vmem [resolvable:$true] %s33_s28 }
   0x4   :  { %s755_s10 = smov 8   ;;  %s756_s11 = smov [#allocation3]  }
   0x5   :  { %39 = dma.hbm_to_vmem [thread:$0]  %s32_s26, 512, %s34_s28, [#allocation7], %s754_s9, %s754_s9, %s755_s10  }
   0x6   :  { %s23_s12 = sshll.u32 %s756_s11, 4  ;;  %s46_s15 = sshll.u32 %s829_s3, 4  ;;  %s24_s12 = int_to_ptr.vmem [resolvable:$true] %s23_s12  ;;  %s47_s15 = int_to_ptr.hbm [resolvable:$true] %s46_s15 }
   0x7   :  { %26 = dma.hbm_to_vmem [thread:$0]  %s22_s8, 128, %s24_s12, [#allocation4]  }
   0x8   :  { %s757_s1 = smov [#allocation8]  }
   0x9   :  { %s48_s16 = sshll.u32 %s757_s1, 4  ;;  %s49_s16 = int_to_ptr.vmem [resolvable:$true] %s48_s16 }
   0xa   :  { %54 = dma.hbm_to_vmem [thread:$0]  %s47_s15, 4096, %s49_s16, [#allocation7], %s754_s9, %s754_s9, %s755_s10  }
   0xb   :  { %747 = dma.done.wait [#allocation4], 128  }
   0xc   :  { %748 = vsyncadd [#allocation4], 4294967168 }
   0xd   :  { %749 = dma.done.wait [#allocation7], 4608  }
   0xe   :  { %750 = vsyncadd [#allocation7], 4294962688  ;;  %vm108_vm0 = vcmask 1043456   ;;  %vm109_vm1 = vcmask 1044480   ;;  %v758_v0 = vmov 65535   ;;  %v74_v14 = vld [vmem:[#allocation3] sm:$0xff] }
   0xf   :  { %v110_v1 = vsel %vm108_vm0, 4294967295, %v758_v0  ;;  %v472_v3 = vld [vmem:[#allocation6 + $0x10] sm:$0xf]  ;;  %v611_v4 = vld [vmem:[#allocation6 + $0x14] sm:$0x10]  ;;  %v75_v38 = vpack.c.bf16 %v74_v14, %v74_v14  ;;  %vm104_vm2 = vcmask 203776  }
  0x10   :  { %v111_v2 = vsel %vm109_vm1, %v110_v1, 0  ;;  %v610_v5 = vld [vmem:[#allocation6 + $0x14] sm:$0xf]  ;;  %v473_v6 = vor.u32 %v611_v4, %v472_v3  ;;  %v474_v7 = vld [vmem:[#allocation6 + $0x18] sm:$0x10]  ;;  %s759_s20 = smov [#allocation9]  }
  0x11   :  { %v464_v8 = vld [vmem:[#allocation6] sm:$0xf]  ;;  %v477_v9 = vor.u32 %v610_v5, %v474_v7  ;;  %v609_v10 = vld [vmem:[#allocation6 + $0x4] sm:$0xf0]  ;;  %v608_v11 = vld [vmem:[#allocation6 + $0x4] sm:$0xf] }
  0x12   :  { %v466_v12 = vld [vmem:[#allocation6 + $0x8] sm:$0xf0]  ;;  %v113_v13 = vand.u32 %v473_v6, %v111_v2  ;;  %v538_v15 = vld [vmem:[#allocation8 + $0x70] sm:$0xf]  ;;  %v627_v16 = vld [vmem:[#allocation8 + $0x74] sm:$0xf0]  ;;  %v465_v23 = vor.u32 %v609_v10, %v464_v8 }
  0x13   :  { %v602_v17 = vld [vmem:[#allocation8 + $0xf0] sm:$0xf]  ;;  %v116_v18 = vand.u32 %v477_v9, %v111_v2  ;;  %v539_v19 = vor.u32 %v627_v16, %v538_v15  ;;  %v643_v20 = vld [vmem:[#allocation8 + $0xf4] sm:$0xf0]  ;;  %v626_v21 = vld [vmem:[#allocation8 + $0x74] sm:$0xf]  ;;  %v469_v28 = vor.u32 %v608_v11, %v466_v12 }
  0x14   :  { %v540_v22 = vld [vmem:[#allocation8 + $0x78] sm:$0xf0]  ;;  %124 = vmatpush.bf16.msra.mxu0 %v113_v13  ;;  %v603_v24 = vor.u32 %v643_v20, %v602_v17  ;;  %v642_v25 = vld [vmem:[#allocation8 + $0xf4] sm:$0xf]  ;;  %v530_v27 = vld [vmem:[#allocation8 + $0x60] sm:$0xf] }
  0x15   :  { %v604_v26 = vld [vmem:[#allocation8 + $0xf8] sm:$0xf0]  ;;  %137 = vmatpush.bf16.msra.mxu1 %v116_v18  ;;  %346 = vmatpush.bf16.msra.mxu2 %v539_v19  ;;  %v543_v29 = vor.u32 %v626_v21, %v540_v22  ;;  %v625_v30 = vld [vmem:[#allocation8 + $0x64] sm:$0xf0]  ;;  %v594_v31 = vld [vmem:[#allocation8 + $0xe0] sm:$0xf] }
  0x16   :  { %v641_v32 = vld [vmem:[#allocation8 + $0xe4] sm:$0xf0]  ;;  %359 = vmatpush.bf16.msra.mxu3 %v603_v24  ;;  %v607_v33 = vor.u32 %v642_v25, %v604_v26  ;;  %v531_v34 = vor.u32 %v625_v30, %v530_v27  ;;  %v624_v35 = vld [vmem:[#allocation8 + $0x64] sm:$0xf]  ;;  %v532_v36 = vld [vmem:[#allocation8 + $0x68] sm:$0xf0] }
  0x17   :  { %v640_v37 = vld [vmem:[#allocation8 + $0xe4] sm:$0xf]  ;;  %v595_v39 = vor.u32 %v641_v32, %v594_v31  ;;  %v596_v40 = vld [vmem:[#allocation8 + $0xe8] sm:$0xf0]  ;;  %v522_v41 = vld [vmem:[#allocation8 + $0x50] sm:$0xf]  ;;  %v535_v45 = vor.u32 %v624_v35, %v532_v36 }
  0x18   :  { %v623_v42 = vld [vmem:[#allocation8 + $0x54] sm:$0xf0]  ;;  %125 = vmatpush.bf16.msra.mxu0 %v465_v23  ;;  %v586_v43 = vld [vmem:[#allocation8 + $0xd0] sm:$0xf]  ;;  %v599_v46 = vor.u32 %v640_v37, %v596_v40  ;;  %v622_v48 = vld [vmem:[#allocation8 + $0x54] sm:$0xf] }
  0x19   :  { %v639_v44 = vld [vmem:[#allocation8 + $0xd4] sm:$0xf0]  ;;  %138 = vmatpush.bf16.msra.mxu1 %v469_v28  ;;  %347 = vmatpush.bf16.msra.mxu2 %v531_v34  ;;  %v523_v47 = vor.u32 %v623_v42, %v522_v41  ;;  %v524_v49 = vld [vmem:[#allocation8 + $0x58] sm:$0xf0]  ;;  %v638_v50 = vld [vmem:[#allocation8 + $0xd4] sm:$0xf] }
  0x1a   :  { %360 = vmatpush.bf16.msra.mxu3 %v595_v39  ;;  %v587_v51 = vor.u32 %v639_v44, %v586_v43  ;;  %v588_v52 = vld [vmem:[#allocation8 + $0xd8] sm:$0xf0]  ;;  %v514_v53 = vld [vmem:[#allocation8 + $0x40] sm:$0xf]  ;;  %v621_v54 = vld [vmem:[#allocation8 + $0x44] sm:$0xf0]  ;;  %v527_v57 = vor.u32 %v622_v48, %v524_v49 }
  0x1b   :  { %478 = vmatmul.msk.bf16.vlgmr.msra.gmra.mxu0 %vm104_vm2, %v75_v38  ;;  %v578_v55 = vld [vmem:[#allocation8 + $0xc0] sm:$0xf]  ;;  %v637_v56 = vld [vmem:[#allocation8 + $0xc4] sm:$0xf0]  ;;  %v591_v58 = vor.u32 %v638_v50, %v588_v52  ;;  %v515_v59 = vor.u32 %v621_v54, %v514_v53  ;;  %v620_v60 = vld [vmem:[#allocation8 + $0x44] sm:$0xf] }
  0x1c   :  { %372 = vmatpush.bf16.msrb.mxu0 %v543_v29  ;;  %479 = vmatmul.msk.bf16.vlgmr.msra.gmra.mxu1 %vm104_vm2, %v75_v38  ;;  %v516_v61 = vld [vmem:[#allocation8 + $0x48] sm:$0xf0]  ;;  %v636_v62 = vld [vmem:[#allocation8 + $0xc4] sm:$0xf]  ;;  %v579_v63 = vor.u32 %v637_v56, %v578_v55  ;;  %v506_v1 = vld [vmem:[#allocation8 + $0x30] sm:$0xf] }
  0x1d   :  { %385 = vmatpush.bf16.msrb.mxu1 %v607_v33  ;;  %348 = vmatpush.bf16.msra.mxu2 %v523_v47  ;;  %v580_v0 = vld [vmem:[#allocation8 + $0xc8] sm:$0xf0]  ;;  %v619_v2 = vld [vmem:[#allocation8 + $0x34] sm:$0xf0]  ;;  %v570_v3 = vld [vmem:[#allocation8 + $0xb0] sm:$0xf]  ;;  %v519_v5 = vor.u32 %v620_v60, %v516_v61 }
  0x1e   :  { %361 = vmatpush.bf16.msra.mxu3 %v587_v51  ;;  %v635_v4 = vld [vmem:[#allocation8 + $0xb4] sm:$0xf0]  ;;  %v583_v6 = vor.u32 %v636_v62, %v580_v0  ;;  %v507_v7 = vor.u32 %v619_v2, %v506_v1  ;;  %v618_v8 = vld [vmem:[#allocation8 + $0x34] sm:$0xf]  ;;  %v508_v9 = vld [vmem:[#allocation8 + $0x38] sm:$0xf0] }
  0x1f   :  { %v634_v10 = vld [vmem:[#allocation8 + $0xb4] sm:$0xf]  ;;  %v571_v11 = vor.u32 %v635_v4, %v570_v3  ;;  %v572_v12 = vld [vmem:[#allocation8 + $0xb8] sm:$0xf0]  ;;  %v498_v13 = vld [vmem:[#allocation8 + $0x20] sm:$0xf]  ;;  %v511_v17 = vor.u32 %v618_v8, %v508_v9 }
  0x20   :  { %373 = vmatpush.bf16.msrb.mxu0 %v535_v45  ;;  %v617_v14 = vld [vmem:[#allocation8 + $0x24] sm:$0xf0]  ;;  %v562_v15 = vld [vmem:[#allocation8 + $0xa0] sm:$0xf]  ;;  %v575_v18 = vor.u32 %v634_v10, %v572_v12  ;;  %v616_v20 = vld [vmem:[#allocation8 + $0x24] sm:$0xf] }
  0x21   :  { %386 = vmatpush.bf16.msrb.mxu1 %v599_v46  ;;  %349 = vmatpush.bf16.msra.mxu2 %v515_v59  ;;  %v633_v16 = vld [vmem:[#allocation8 + $0xa4] sm:$0xf0]  ;;  %v499_v19 = vor.u32 %v617_v14, %v498_v13  ;;  %v500_v21 = vld [vmem:[#allocation8 + $0x28] sm:$0xf0]  ;;  %v632_v23 = vld [vmem:[#allocation8 + $0xa4] sm:$0xf] }
  0x22   :  { %362 = vmatpush.bf16.msra.mxu3 %v579_v63  ;;  %v563_v22 = vor.u32 %v633_v16, %v562_v15  ;;  %v564_v24 = vld [vmem:[#allocation8 + $0xa8] sm:$0xf0]  ;;  %v503_v25 = vor.u32 %v616_v20, %v500_v21  ;;  %v490_v27 = vld [vmem:[#allocation8 + $0x10] sm:$0xf]  ;;  %v615_v28 = vld [vmem:[#allocation8 + $0x14] sm:$0xf0] }
  0x23   :  { %v567_v26 = vor.u32 %v632_v23, %v564_v24  ;;  %v554_v29 = vld [vmem:[#allocation8 + $0x90] sm:$0xf]  ;;  %v491_v30 = vor.u32 %v615_v28, %v490_v27  ;;  %v631_v31 = vld [vmem:[#allocation8 + $0x94] sm:$0xf0]  ;;  %v614_v32 = vld [vmem:[#allocation8 + $0x14] sm:$0xf]  ;;  %v440_v28 = vstv %s832_s6 }
  0x24   :  { %374 = vmatpush.bf16.msrb.mxu0 %v527_v57  ;;  %v492_v33 = vld [vmem:[#allocation8 + $0x18] sm:$0xf0]  ;;  %v555_v34 = vor.u32 %v631_v31, %v554_v29  ;;  %v630_v36 = vld [vmem:[#allocation8 + $0x94] sm:$0xf]  ;;  %v482_v39 = vld [vmem:[#allocation8] sm:$0xf] }
  0x25   :  { %387 = vmatpush.bf16.msrb.mxu1 %v591_v58  ;;  %350 = vmatpush.bf16.msra.mxu2 %v507_v7  ;;  %v495_v35 = vor.u32 %v614_v32, %v492_v33  ;;  %v556_v37 = vld [vmem:[#allocation8 + $0x98] sm:$0xf0]  ;;  %v613_v40 = vld [vmem:[#allocation8 + $0x4] sm:$0xf0]  ;;  %v546_v41 = vld [vmem:[#allocation8 + $0x80] sm:$0xf] }
  0x26   :  { %363 = vmatpush.bf16.msra.mxu3 %v571_v11  ;;  %v559_v38 = vor.u32 %v630_v36, %v556_v37  ;;  %v483_v42 = vor.u32 %v613_v40, %v482_v39  ;;  %v629_v43 = vld [vmem:[#allocation8 + $0x84] sm:$0xf0]  ;;  %v612_v44 = vld [vmem:[#allocation8 + $0x4] sm:$0xf]  ;;  %v484_v45 = vld [vmem:[#allocation8 + $0x8] sm:$0xf0] }
  0x27   :  { %v547_v46 = vor.u32 %v629_v43, %v546_v41  ;;  %v487_v47 = vor.u32 %v612_v44, %v484_v45  ;;  %v628_v48 = vld [vmem:[#allocation8 + $0x84] sm:$0xf]  ;;  %v548_v49 = vld [vmem:[#allocation8 + $0x88] sm:$0xf0]  ;;  %v80_v51 = vld [vmem:[%s828_s2] sm:$0x3] }
  0x28   :  { %375 = vmatpush.bf16.msrb.mxu0 %v519_v5  ;;  %v551_v50 = vor.u32 %v628_v48, %v548_v49  ;;  %v82_v52 = vperm.slane %v80_v51, 0  ;;  %v83_v53 = vperm.slane %v80_v51, 1  ;;  %v400_v0 = vld [vmem:[%s831_s5] sm:$0x3]  ;;  %s449_s21 = sshll.u32 %s759_s20, 4  ;;  %s451_s24 = sshll.u32 %s833_s7, 4  ;;  %s450_s21 = int_to_ptr.vmem [resolvable:$true] %s449_s21  ;;  %s452_s24 = int_to_ptr.hbm [resolvable:$true] %s451_s24 }
  0x29   :  { %388 = vmatpush.bf16.msrb.mxu1 %v583_v6  ;;  %351 = vmatpush.bf16.msra.mxu2 %v499_v19  ;;  %402 = vst [vmem:[#allocation1] ss:$9 sm:$0xff] %v400_v0  ;;  %v180_v1 = vld [vmem:[%s830_s4] sm:$0x3]  ;;  %vm442_vm3 = vcmask 57344  }
  0x2a   :  { %364 = vmatpush.bf16.msra.mxu3 %v563_v22  ;;  %v183_v2 = vperm.slane %v180_v1, 1  ;;  %v182_v7 = vperm.slane %v180_v1, 0 }
  0x2c   :  { %376 = vmatpush.bf16.msrb.mxu0 %v511_v17 }
  0x2d   :  { %389 = vmatpush.bf16.msrb.mxu1 %v575_v18  ;;  %352 = vmatpush.bf16.msra.mxu2 %v491_v30 }
  0x2e   :  { %365 = vmatpush.bf16.msra.mxu3 %v555_v34 }
  0x30   :  { %377 = vmatpush.bf16.msrb.mxu0 %v503_v25  ;;  %v404_v9 = vld [vmem:[#allocation1 + $0x9] sm:$0xff]  ;;  %v403_v19 = vld [vmem:[#allocation1] sm:$0xff] }
  0x31   :  { %390 = vmatpush.bf16.msrb.mxu1 %v567_v26  ;;  %353 = vmatpush.bf16.msra.mxu2 %v483_v42  ;;  %v408_v15 = vpack.i.b16 %v404_v9, %v404_v9  ;;  %v405_v23 = vpack.i.b16 %v403_v19, %v403_v19 }
  0x32   :  { %366 = vmatpush.bf16.msra.mxu3 %v547_v46 }
  0x33   :  { %v410_v20 = vperm.slane %v408_v15, 0  ;;  %v407_v25 = vperm.slane %v405_v23, 0 }
  0x34   :  { %378 = vmatpush.bf16.msrb.mxu0 %v495_v35 }
  0x35   :  { %391 = vmatpush.bf16.msrb.mxu1 %v559_v38 }
  0x38   :  { %379 = vmatpush.bf16.msrb.mxu0 %v487_v47 }
  0x39   :  { %392 = vmatpush.bf16.msrb.mxu1 %v551_v50 }
  0x98   :  { %v127_v54 = vpop.f32.mrf.mxu0 }
  0x99   :  { %v128_v55 = vadd.f32 %v127_v54, %v82_v52  ;;  %v140_v56 = vpop.f32.mrf.mxu1 }
  0x9a   :  { %v141_v57 = vadd.f32 %v140_v56, %v83_v53 }
  0x9b   :  { %v144_v58 = vmax.f32 %v128_v55, 0.0 }
  0x9c   :  { %v145_v59 = vmax.f32 %v141_v57, 0.0 }
  0x9d   :  { %v146_v60 = vpack.c.bf16 %v144_v58, %v144_v58 }
  0x9e   :  { %v147_v61 = vpack.c.bf16 %v145_v59, %v145_v59 }
  0x9f   :  { %354 = vmatmul.bf16.vlgmr.msra.gmra.mxu2 %v146_v60  ;;  %380 = vmatmul.bf16.vlgmr.msrb.gmra.mxu0 %v146_v60 }
  0xa0   :  { %367 = vmatmul.bf16.vlgmr.msra.gmra.mxu3 %v147_v61  ;;  %393 = vmatmul.bf16.vlgmr.msrb.gmra.mxu1 %v147_v61  ;;  %v129_v62 = vpop.f32.mrf.mxu0 }
  0xa1   :  { %v142_v63 = vpop.f32.mrf.mxu1 }
 0x11c   :  { %v381_v3 = vpop.f32.mrf.mxu0 }
 0x11d   :  { %v382_v4 = vadd.f32 %v381_v3, %v183_v2  ;;  %v394_v5 = vpop.f32.mrf.mxu1 }
 0x11f   :  { %v395_v6 = vadd.f32 %v394_v5, %v382_v4 }
 0x121   :  { %v399_v8 = vmax.f32 %v395_v6, 0.0 }
 0x122   :  { %v355_v10 = vpop.f32.mrf.mxu2 }
 0x123   :  { %v356_v11 = vadd.f32 %v355_v10, %v182_v7  ;;  %v368_v12 = vpop.f32.mrf.mxu3  ;;  %v412_v13 = vpack.c.bf16 %v399_v8, %v399_v8 }
 0x124   :  { %v383_v14 = vpop.f32.mrf.mxu0 }
 0x125   :  { %v369_v16 = vadd.f32 %v368_v12, %v356_v11  ;;  %v396_v17 = vpop.f32.mrf.mxu1  ;;  %433 = vmatpush.bf16.xpose.msrb.mxu3 %v412_v13 }
 0x127   :  { %v398_v18 = vmax.f32 %v369_v16, 0.0 }
 0x129   :  { %v411_v21 = vpack.c.bf16 %v398_v18, %v398_v18 }
 0x12a   :  { %v357_v22 = vpop.f32.mrf.mxu2 }
 0x12b   :  { %v370_v24 = vpop.f32.mrf.mxu3  ;;  %420 = vmatpush.bf16.xpose.msrb.mxu2 %v411_v21 }
 0x12c   :  { %434 = vmatmul.bf16.vlgmr.msrb.gmra.mxu3 %v410_v20 }
 0x132   :  { %421 = vmatmul.bf16.vlgmr.msrb.gmra.mxu2 %v407_v25 }
 0x1af   :  { %v435_v26 = vpop.f32.mrf.mxu3 }
 0x1b5   :  { %v422_v27 = vpop.f32.mrf.mxu2 }
 0x1b6   :  { %v436_v29 = vadd.f32 %v435_v26, %v422_v27 }
 0x1b7   :  { %v437_v30 = vpop.f32.mrf.mxu3 }
 0x1b8   :  { %v441_v31 = vadd.f32 %v440_v28, %v436_v29 }
 0x1ba   :  { %443 = vst.msk [vmem:[#allocation9] sm:$0x1] %vm442_vm3, %v441_v31 }
 0x1bb   :  { %454 = dma.vmem_to_hbm [thread:$0]  %s450_s21, 16, %s452_s24, [#allocation5]  }
 0x1bd   :  { %v424_v32 = vpop.f32.mrf.mxu2 }
 0x1be   :  { %751 = dma.done.wait [#allocation5], 16  }
 0x1bf   :  { %752 = vsyncadd [#allocation5], 4294967280 }
 0x1c0   :  { %459 = vsyncpa [#allocation4], 1 }
 0x1c1   :  { %460 = vsyncpa [#allocation7], 1 }
 0x1c2   :  { %461 = vsyncpa [#allocation5], 1 }

</bundles_post_ra>
